<compile_context>
chip_gen: v7x
topology: tpu7x:2x2x1
jax: 0.10.0
libtpu: 0.0.40
codegen_flags: <defaults>
</compile_context>

<pallas_src>
import jax
import jax.numpy as jnp
from jax.experimental import pallas as pl
from jax.experimental.pallas import tpu as pltpu

_LANE = 128
_BIG = 1e30  # Python float sentinel -> baked as a literal, never a captured const


def _make_triplet_kernel(margin):
    margin = float(margin)

    def kernel(xt_ref, xj_ref, sqj_ref, sqi_ref, lj_ref, li_ref,
               out_ref, ap_acc, an_acc):
        j = pl.program_id(1)

        @pl.when(j == 0)
        def _init():
            ap_acc[...] = jnp.full_like(ap_acc, -_BIG)
            an_acc[...] = jnp.full_like(an_acc, _BIG)

        # (TJ, TI) gram block on the MXU: candidates x queries, plain matmul
        # (query operand arrives pre-transposed, so no in-kernel transpose).
        gram = jnp.dot(xj_ref[...], xt_ref[...],
                       preferred_element_type=jnp.float32)          # (TJ, TI)

        # Mine on m = ||x_j||^2 - 2 <x_j, x_i>; the per-query constant
        # ||x_i||^2 is added once in finalize (monotone shift per column).
        m = sqj_ref[...] - 2.0 * gram                                # (TJ, TI)

        mask = lj_ref[...] == li_ref[...]                            # (TJ, TI)

        tile_ap = jnp.max(jnp.where(mask, m, -_BIG), axis=0, keepdims=True)
        tile_an = jnp.min(jnp.where(mask, _BIG, m), axis=0, keepdims=True)
        ap_acc[...] = jnp.maximum(ap_acc[...], tile_ap)              # (1, TI) lane-dense
        an_acc[...] = jnp.minimum(an_acc[...], tile_an)

        @pl.when(j == pl.num_programs(1) - 1)
        def _finalize():
            sqi = sqi_ref[...]                                       # (1, TI)
            # sqrt only on the two mined (1, TI) vectors.
            dist_ap = jnp.sqrt(jnp.maximum(ap_acc[...] + sqi, 1e-12))
            dist_an = jnp.sqrt(jnp.maximum(an_acc[...] + sqi, 1e-12))
            out_ref[...] = jnp.maximum(dist_ap - dist_an + margin, 0.0)

    return kernel


def _select_tiles(n_pad, d, itemsize):
    # Query (lane) tile: multiple of 128, <= 512, and <= n_pad // 2 when
    # possible so the "parallel" row axis has >= 2 blocks (v7x megacore).
    ti = min(512, n_pad)
    if n_pad >= 2 * _LANE:
        ti = min(ti, n_pad // 2)
    ti = max(_LANE, (ti // _LANE) * _LANE)
    while n_pad % ti:
        ti -= _LANE

    # Candidate (sublane) tile: single pass over the whole axis when the
    # candidate block plus the (TJ, TI) f32 temporaries comfortably fit scoped
    # VMEM (typical re-id batches), otherwise a 128-aligned streamed tile.
    single_pass_bytes = n_pad * d * itemsize + 4 * n_pad * ti * 4
    if single_pass_bytes <= 12 * 1024 * 1024:
        tj = n_pad
    else:
        tj = min(512, n_pad)
        while n_pad % tj:
            tj -= _LANE
    return ti, tj


def triplet_loss(inputs, targets, margin=0.3):
    """inputs: (N, D) float features; targets: (N,) integer labels."""
    n, d = inputs.shape
    n_pad = ((n + _LANE - 1) // _LANE) * _LANE
    pad = n_pad - n
    itemsize = jnp.dtype(inputs.dtype).itemsize
    ti, tj = _select_tiles(n_pad, d, itemsize)

    targets = targets.astype(jnp.int32)

    # Pad: zero feature rows, label distinct from every real label, and a huge
    # sentinel squared norm so padded rows are never the hardest pos/neg.
    x_pad = jnp.pad(inputs, ((0, pad), (0, 0)))
    if pad:
        pad_label = jnp.min(targets) - 1
        t_pad = jnp.concatenate(
            [targets, jnp.full((pad,), pad_label, dtype=jnp.int32)])
    else:
        t_pad = targets

    x32 = x_pad.astype(jnp.float32)
    sq = jnp.sum(x32 * x32, axis=1, keepdims=True)           # (n_pad, 1) f32
    if pad:
        sq = sq.at[n:, :].set(_BIG)

    x_t = x_pad.T                                            # (d, n_pad) query operand
    sq_row = sq.reshape(1, n_pad)                            # (1, n_pad) query norms
    t_cand = t_pad.reshape(n_pad, 1)                         # (n_pad, 1)
    t_row = t_pad.reshape(1, n_pad)                          # (1, n_pad)

    grid = (n_pad // ti, n_pad // tj)

    # Rough VMEM hint: double-buffered operands + f32 tile temporaries.
    est = 2 * itemsize * d * (ti + tj) + 6 * 4 * ti * tj + 8 * 4 * (ti + tj)
    vmem_limit = int(min(48 * 1024 * 1024, max(32 * 1024 * 1024, 2 * est)))

    per_row = pl.pallas_call(
        _make_triplet_kernel(margin),
        out_shape=jax.ShapeDtypeStruct((1, n_pad), jnp.float32),
        grid_spec=pltpu.PrefetchScalarGridSpec(
            num_scalar_prefetch=0,
            grid=grid,                                        # candidate (reduction) axis last
            in_specs=[
                pl.BlockSpec((d, ti), lambda i, j: (0, i)),   # x^T query block (resident over j)
                pl.BlockSpec((tj, d), lambda i, j: (j, 0)),   # x candidate block (streams over j)
                pl.BlockSpec((tj, 1), lambda i, j: (j, 0)),   # ||x_j||^2
                pl.BlockSpec((1, ti), lambda i, j: (0, i)),   # ||x_i||^2 (finalize only)
                pl.BlockSpec((tj, 1), lambda i, j: (j, 0)),   # labels (candidate view)
                pl.BlockSpec((1, ti), lambda i, j: (0, i)),   # labels (query view)
            ],
            out_specs=pl.BlockSpec((1, ti), lambda i, j: (0, i)),
            scratch_shapes=[pltpu.VMEM((1, ti), jnp.float32),   # running max (ap^2 - sqi)
                            pltpu.VMEM((1, ti), jnp.float32)],  # running min (an^2 - sqi)
        ),
        compiler_params=pltpu.CompilerParams(
            dimension_semantics=("parallel", "arbitrary"),      # rows shard on v7x
            vmem_limit_bytes=vmem_limit,
        ),
    )(x_t, x_pad, sq, sq_row, t_cand, t_row)

    # MarginRankingLoss(y=1, reduction='mean') over the real rows only.
    valid = jnp.arange(n_pad)[None, :] < n
    return jnp.sum(jnp.where(valid, per_row, 0.0)) / n


def _reference_triplet_loss(inputs, targets, margin=0.3):
    # Pure-JAX reference mirroring the PyTorch module exactly.
    x = inputs.astype(jnp.float32)
    sq = jnp.sum(x * x, axis=1, keepdims=True)
    dist = sq + sq.T - 2.0 * (x @ x.T)
    dist = jnp.sqrt(jnp.maximum(dist, 1e-12))
    mask = targets[:, None] == targets[None, :]
    dist_ap = jnp.max(jnp.where(mask, dist, -jnp.inf), axis=1)
    dist_an = jnp.min(jnp.where(mask, jnp.inf, dist), axis=1)
    return jnp.mean(jnp.maximum(dist_ap - dist_an + margin, 0.0))


if __name__ == "__main__":
    key = jax.random.PRNGKey(0)
    n, d = 8, 32
    inputs = jax.random.normal(key, (n, d), dtype=jnp.float32)
    # deterministic labels: 4 identities x 2 samples each
    targets = jnp.array([0, 0, 1, 1, 2, 2, 3, 3], dtype=jnp.int32)

    loss = triplet_loss(inputs, targets, margin=0.3)
    loss = jax.block_until_ready(loss)

    ref = _reference_triplet_loss(inputs, targets, margin=0.3)
    assert jnp.allclose(loss, ref, atol=1e-5, rtol=1e-5), (loss, ref)
    print("KERNEL_OK")
</pallas_src>

<mosaic_0001>
module attributes {stable_mosaic.version = 11 : i64} {
  func.func @kernel(%arg0: i32, %arg1: i32, %arg2: memref<32x128xf32, #tpu.memory_space<vmem>>, %arg3: memref<128x32xf32, #tpu.memory_space<vmem>>, %arg4: memref<128x1xf32, #tpu.memory_space<vmem>>, %arg5: memref<1x128xf32, #tpu.memory_space<vmem>>, %arg6: memref<128x1xi32, #tpu.memory_space<vmem>>, %arg7: memref<1x128xi32, #tpu.memory_space<vmem>>, %arg8: memref<1x128xf32, #tpu.memory_space<vmem>>, %arg9: memref<1x128xf32, #tpu.memory_space<vmem>>, %arg10: memref<1x128xf32, #tpu.memory_space<vmem>>) attributes {dimension_semantics = [#tpu.dimension_semantics<parallel>, #tpu.dimension_semantics<arbitrary>], iteration_bounds = array<i64: 1, 1>, scalar_prefetch = 0 : i64, scratch_operands = 2 : i64, tpu.core_type = #tpu.core_type<tc>, window_params = [{transform_indices = @transform_0, window_bounds = array<i64: 32, 128>}, {transform_indices = @transform_1, window_bounds = array<i64: 128, 32>}, {transform_indices = @transform_2, window_bounds = array<i64: 128, 1>}, {transform_indices = @transform_3, window_bounds = array<i64: 1, 128>}, {transform_indices = @transform_4, window_bounds = array<i64: 128, 1>}, {transform_indices = @transform_5, window_bounds = array<i64: 1, 128>}, {transform_indices = @transform_6, window_bounds = array<i64: 1, 128>}]} {
    %c0_i32 = arith.constant 0 : i32
    %0 = arith.cmpi eq, %arg1, %c0_i32 : i32
    %1 = arith.extui %0 : i1 to i32
    %c0_i32_0 = arith.constant 0 : i32
    %2 = arith.cmpi ne, %1, %c0_i32_0 : i32
    scf.if %2 {
      %cst_25 = arith.constant -1.000000e+30 : f32
      %33 = vector.broadcast %cst_25 : f32 to vector<1x128xf32>
      %c0_26 = arith.constant 0 : index
      %c0_27 = arith.constant 0 : index
      %34 = vector.load %arg9[%c0_26, %c0_27] : memref<1x128xf32, #tpu.memory_space<vmem>>, vector<1x128xf32>
      tpu.vector_store %arg9[%c0_26, %c0_27], %33 {strides = array<i32>} : memref<1x128xf32, #tpu.memory_space<vmem>>, vector<1x128xf32>,
      %cst_28 = arith.constant 1.000000e+30 : f32
      %35 = vector.broadcast %cst_28 : f32 to vector<1x128xf32>
      %c0_29 = arith.constant 0 : index
      %c0_30 = arith.constant 0 : index
      %36 = vector.load %arg10[%c0_29, %c0_30] : memref<1x128xf32, #tpu.memory_space<vmem>>, vector<1x128xf32>
      tpu.vector_store %arg10[%c0_29, %c0_30], %35 {strides = array<i32>} : memref<1x128xf32, #tpu.memory_space<vmem>>, vector<1x128xf32>,
    } else {
    }
    %c0 = arith.constant 0 : index
    %c0_1 = arith.constant 0 : index
    %3 = vector.load %arg3[%c0, %c0_1] : memref<128x32xf32, #tpu.memory_space<vmem>>, vector<128x32xf32>
    %c0_2 = arith.constant 0 : index
    %c0_3 = arith.constant 0 : index
    %4 = vector.load %arg2[%c0_2, %c0_3] : memref<32x128xf32, #tpu.memory_space<vmem>>, vector<32x128xf32>
    %cst = arith.constant dense<0.000000e+00> : vector<128x128xf32>
    %5 = tpu.matmul %3, %4, %cst {dimension_numbers = #tpu.dot_dimension_numbers<[1], [0], [0], [1], [0, 0, 1, 1], [], []>} : vector<128x32xf32>, vector<32x128xf32>, vector<128x128xf32> -> vector<128x128xf32>
    %c0_4 = arith.constant 0 : index
    %c0_5 = arith.constant 0 : index
    %6 = vector.load %arg4[%c0_4, %c0_5] : memref<128x1xf32, #tpu.memory_space<vmem>>, vector<128x1xf32>
    %cst_6 = arith.constant 2.000000e+00 : f32
    %7 = vector.broadcast %cst_6 : f32 to vector<128x128xf32>
    %8 = arith.mulf %7, %5 : vector<128x128xf32>
    %9 = vector.broadcast %6 : vector<128x1xf32> to vector<128x128xf32>
    %10 = arith.subf %9, %8 : vector<128x128xf32>
    %c0_7 = arith.constant 0 : index
    %c0_8 = arith.constant 0 : index
    %11 = vector.load %arg6[%c0_7, %c0_8] : memref<128x1xi32, #tpu.memory_space<vmem>>, vector<128x1xi32>
    %c0_9 = arith.constant 0 : index
    %c0_10 = arith.constant 0 : index
    %12 = vector.load %arg7[%c0_9, %c0_10] : memref<1x128xi32, #tpu.memory_space<vmem>>, vector<1x128xi32>
    %13 = vector.broadcast %11 : vector<128x1xi32> to vector<128x128xi32>
    %14 = vector.broadcast %12 : vector<1x128xi32> to vector<128x128xi32>
    %15 = arith.cmpi eq, %13, %14 : vector<128x128xi32>
    %cst_11 = arith.constant -1.000000e+30 : f32
    %16 = vector.broadcast %cst_11 : f32 to vector<128x128xf32>
    %17 = arith.select %15, %10, %16 : vector<128x128xi1>, vector<128x128xf32>
    %cst_12 = arith.constant dense<0xFF800000> : vector<128xf32>
    %18 = vector.multi_reduction <maximumf>, %17, %cst_12 [0] : vector<128x128xf32> to vector<128xf32>
    %19 = vector.shape_cast %18 : vector<128xf32> to vector<1x128xf32>
    %cst_13 = arith.constant 1.000000e+30 : f32
    %20 = vector.broadcast %cst_13 : f32 to vector<128x128xf32>
    %21 = arith.select %15, %20, %10 : vector<128x128xi1>, vector<128x128xf32>
    %cst_14 = arith.constant dense<0x7F800000> : vector<128xf32>
    %22 = vector.multi_reduction <minimumf>, %21, %cst_14 [0] : vector<128x128xf32> to vector<128xf32>
    %23 = vector.shape_cast %22 : vector<128xf32> to vector<1x128xf32>
    %c0_15 = arith.constant 0 : index
    %c0_16 = arith.constant 0 : index
    %24 = vector.load %arg9[%c0_15, %c0_16] : memref<1x128xf32, #tpu.memory_space<vmem>>, vector<1x128xf32>
    %25 = arith.maximumf %24, %19 : vector<1x128xf32>
    %c0_17 = arith.constant 0 : index
    %c0_18 = arith.constant 0 : index
    %26 = vector.load %arg9[%c0_17, %c0_18] : memref<1x128xf32, #tpu.memory_space<vmem>>, vector<1x128xf32>
    tpu.vector_store %arg9[%c0_17, %c0_18], %25 {strides = array<i32>} : memref<1x128xf32, #tpu.memory_space<vmem>>, vector<1x128xf32>,
    %c0_19 = arith.constant 0 : index
    %c0_20 = arith.constant 0 : index
    %27 = vector.load %arg10[%c0_19, %c0_20] : memref<1x128xf32, #tpu.memory_space<vmem>>, vector<1x128xf32>
    %28 = arith.minimumf %27, %23 : vector<1x128xf32>
    %c0_21 = arith.constant 0 : index
    %c0_22 = arith.constant 0 : index
    %29 = vector.load %arg10[%c0_21, %c0_22] : memref<1x128xf32, #tpu.memory_space<vmem>>, vector<1x128xf32>
    tpu.vector_store %arg10[%c0_21, %c0_22], %28 {strides = array<i32>} : memref<1x128xf32, #tpu.memory_space<vmem>>, vector<1x128xf32>,
    %c0_i32_23 = arith.constant 0 : i32
    %30 = arith.cmpi eq, %arg1, %c0_i32_23 : i32
    %31 = arith.extui %30 : i1 to i32
    %c0_i32_24 = arith.constant 0 : i32
    %32 = arith.cmpi ne, %31, %c0_i32_24 : i32
    scf.if %32 {
      %c0_25 = arith.constant 0 : index
      %c0_26 = arith.constant 0 : index
      %33 = vector.load %arg5[%c0_25, %c0_26] : memref<1x128xf32, #tpu.memory_space<vmem>>, vector<1x128xf32>
      %c0_27 = arith.constant 0 : index
      %c0_28 = arith.constant 0 : index
      %34 = vector.load %arg9[%c0_27, %c0_28] : memref<1x128xf32, #tpu.memory_space<vmem>>, vector<1x128xf32>
      %35 = arith.addf %34, %33 : vector<1x128xf32>
      %cst_29 = arith.constant 9.99999996E-13 : f32
      %36 = vector.broadcast %cst_29 : f32 to vector<1x128xf32>
      %37 = arith.maximumf %35, %36 : vector<1x128xf32>
      %38 = math.sqrt %37 : vector<1x128xf32>
      %c0_30 = arith.constant 0 : index
      %c0_31 = arith.constant 0 : index
      %39 = vector.load %arg10[%c0_30, %c0_31] : memref<1x128xf32, #tpu.memory_space<vmem>>, vector<1x128xf32>
      %40 = arith.addf %39, %33 : vector<1x128xf32>
      %cst_32 = arith.constant 9.99999996E-13 : f32
      %41 = vector.broadcast %cst_32 : f32 to vector<1x128xf32>
      %42 = arith.maximumf %40, %41 : vector<1x128xf32>
      %43 = math.sqrt %42 : vector<1x128xf32>
      %44 = arith.subf %38, %43 : vector<1x128xf32>
      %cst_33 = arith.constant 3.000000e-01 : f32
      %45 = vector.broadcast %cst_33 : f32 to vector<1x128xf32>
      %46 = arith.addf %44, %45 : vector<1x128xf32>
      %cst_34 = arith.constant 0.000000e+00 : f32
      %47 = vector.broadcast %cst_34 : f32 to vector<1x128xf32>
      %48 = arith.maximumf %46, %47 : vector<1x128xf32>
      %c0_35 = arith.constant 0 : index
      %c0_36 = arith.constant 0 : index
      %49 = vector.load %arg8[%c0_35, %c0_36] : memref<1x128xf32, #tpu.memory_space<vmem>>, vector<1x128xf32>
      tpu.vector_store %arg8[%c0_35, %c0_36], %48 {strides = array<i32>} : memref<1x128xf32, #tpu.memory_space<vmem>>, vector<1x128xf32>,
    } else {
    }
    return
  }
  func.func @transform_0(%arg0: i32, %arg1: i32) -> (i32, i32) {
    %c0_i32 = arith.constant 0 : i32
    %c0_i32_0 = arith.constant 0 : i32
    return %c0_i32, %arg0 : i32, i32
  }
  func.func @transform_1(%arg0: i32, %arg1: i32) -> (i32, i32) {
    %c0_i32 = arith.constant 0 : i32
    %c0_i32_0 = arith.constant 0 : i32
    return %arg1, %c0_i32 : i32, i32
  }
  func.func @transform_2(%arg0: i32, %arg1: i32) -> (i32, i32) {
    %c0_i32 = arith.constant 0 : i32
    %c0_i32_0 = arith.constant 0 : i32
    return %arg1, %c0_i32 : i32, i32
  }
  func.func @transform_3(%arg0: i32, %arg1: i32) -> (i32, i32) {
    %c0_i32 = arith.constant 0 : i32
    %c0_i32_0 = arith.constant 0 : i32
    return %c0_i32, %arg0 : i32, i32
  }
  func.func @transform_4(%arg0: i32, %arg1: i32) -> (i32, i32) {
    %c0_i32 = arith.constant 0 : i32
    %c0_i32_0 = arith.constant 0 : i32
    return %arg1, %c0_i32 : i32, i32
  }
  func.func @transform_5(%arg0: i32, %arg1: i32) -> (i32, i32) {
    %c0_i32 = arith.constant 0 : i32
    %c0_i32_0 = arith.constant 0 : i32
    return %c0_i32, %arg0 : i32, i32
  }
  func.func @transform_6(%arg0: i32, %arg1: i32) -> (i32, i32) {
    %c0_i32 = arith.constant 0 : i32
    %c0_i32_0 = arith.constant 0 : i32
    return %c0_i32, %arg0 : i32, i32
  }
}

</mosaic_0001>

<bundles_post_ra>
// kernel: tpu_custom_call.1
= control target key start
LH: loop header
LB: loop body
LE: loop exit
PB: predicated region body
PF: predicated region fallthrough
CT: control target
= control target key end

     0   :  { %v694_v3 = vmov 0   ;;  %vm50_vm0 = vcmask 261120   ;;  %s1065_s0 = inlined_call_operand.vmem [shape: f32[32,128], index: 0, kind: input, shape index: {}]   ;;  %s1066_s1 = inlined_call_operand.vmem [shape: f32[128,32], index: 1, kind: input, shape index: {}]   ;;  %s1067_s2 = inlined_call_operand.vmem [shape: f32[128,1], index: 2, kind: input, shape index: {}]   ;;  %s1068_s3 = inlined_call_operand.vmem [shape: f32[1,128], index: 3, kind: input, shape index: {}]   ;;  %s1069_s4 = inlined_call_operand.vmem [shape: s32[128,1], index: 4, kind: input, shape index: {}]   ;;  %s1070_s5 = inlined_call_operand.vmem [shape: s32[1,128], index: 5, kind: input, shape index: {}]   ;;  %s1071_s6 = inlined_call_operand.hbm [shape: f32[1,128], index: 6, kind: output, shape index: {}]  }
   0x1   :  { %v246_v0 = vld [vmem:[%s1067_s2 + $0x10] sm:$0xff]  ;;  %v244_v1 = vld [vmem:[%s1067_s2] sm:$0xff]  ;;  %665 = vset.pattern.permute.xlu1 %v694_v3  ;;  %664 = vset.pattern.permute.xlu0 %v694_v3  ;;  %v47_v4 = vld [vmem:[%s1065_s0 + $0x8] sm:$0xff] }
   0x2   :  { %v46_v2 = vld [vmem:[%s1065_s0] sm:$0xff]  ;;  %288 = vperm.xlu1 %665, %v246_v0   ;;  %278 = vperm.xlu0 %664, %v244_v1   ;;  %v48_v6 = vld [vmem:[%s1065_s0 + $0x10] sm:$0xff]  ;;  %v49_v7 = vld [vmem:[%s1065_s0 + $0x18] sm:$0xff] }
   0x3   :  { %v648_v5 = vpack.c.bf16 %v47_v4, %v46_v2  ;;  %v247_v8 = vld [vmem:[%s1067_s2 + $0x18] sm:$0xff]  ;;  %v245_v9 = vld [vmem:[%s1067_s2 + $0x8] sm:$0xff]  ;;  %v652_v10 = vpack.c.bf16 %v49_v7, %v48_v6  ;;  %v30_v11 = vld [vmem:[%s1066_s1] sm:$0xff] }
   0x4   :  { %v38_v12 = vld [vmem:[%s1066_s1 + $0x40] sm:$0xff]  ;;  %v249_v13 = vld [vmem:[%s1067_s2 + $0x28] sm:$0xff]  ;;  %624 = vmatprep.mubr.msk.f32.mxu0 %vm50_vm0, %v30_v11  ;;  %v32_v17 = vld [vmem:[%s1066_s1 + $0x10] sm:$0xff] }
   0x5   :  { %649 = vmatprep.subr.bf16.mxu0 %v648_v5  ;;  %656 = vmatprep.subr.bf16.mxu1 %v648_v5  ;;  %v248_v14 = vld [vmem:[%s1067_s2 + $0x20] sm:$0xff]  ;;  %v31_v15 = vld [vmem:[%s1066_s1 + $0x8] sm:$0xff]  ;;  %v40_v18 = vld [vmem:[%s1066_s1 + $0x50] sm:$0xff] }
   0x6   :  { %651 = vmatpush3.bf16.msra.mxu0 %v648_v5  ;;  %658 = vmatpush3.bf16.msra.mxu1 %v648_v5  ;;  %v39_v16 = vld [vmem:[%s1066_s1 + $0x48] sm:$0xff]  ;;  %v251_v19 = vld [vmem:[%s1067_s2 + $0x38] sm:$0xff]  ;;  %v250_v20 = vld [vmem:[%s1067_s2 + $0x30] sm:$0xff] }
   0x7   :  { %293 = vperm.xlu1 %665, %v247_v8   ;;  %283 = vperm.xlu0 %664, %v245_v9   ;;  %v33_v21 = vld [vmem:[%s1066_s1 + $0x18] sm:$0xff]  ;;  %v34_v23 = vld [vmem:[%s1066_s1 + $0x20] sm:$0xff]  ;;  %v373_v25 = vld [vmem:[%s1069_s4 + $0x8] sm:$0xff] }
   0x8   :  { %653 = vmatprep.subr.bf16.mxu0 %v652_v10  ;;  %657 = vmatprep.subr.bf16.mxu1 %v652_v10  ;;  %v41_v22 = vld [vmem:[%s1066_s1 + $0x58] sm:$0xff]  ;;  %v42_v24 = vld [vmem:[%s1066_s1 + $0x60] sm:$0xff]  ;;  %v35_v27 = vld [vmem:[%s1066_s1 + $0x28] sm:$0xff] }
   0x9   :  { %636 = vmatprep.mubr.msk.f32.mxu1 %vm50_vm0, %v38_v12  ;;  %v372_v26 = vld [vmem:[%s1069_s4] sm:$0xff]  ;;  %v43_v28 = vld [vmem:[%s1066_s1 + $0x68] sm:$0xff] }
   0xa   :  { %655 = vmatpush3.bf16.msra.mxu0 %v652_v10  ;;  %659 = vmatpush3.bf16.msra.mxu1 %v652_v10 }
   0xb   :  { %303 = vperm.xlu1 %665, %v249_v13   ;;  %298 = vperm.xlu0 %664, %v248_v14  }
   0xd   :  { %625 = vmatmul.mubr.msk.f32.vlgmr.msra.gmra.mrb[0].mxu0 %vm50_vm0, %v31_v15  ;;  %637 = vmatmul.mubr.msk.f32.vlgmr.msra.gmra.mrb[0].mxu1 %vm50_vm0, %v39_v16 }
   0xe   :  { %627 = vmatprep.mubr.msk.f32.mxu0 %vm50_vm0, %v32_v17  ;;  %639 = vmatprep.mubr.msk.f32.mxu1 %vm50_vm0, %v40_v18 }
   0xf   :  { %313 = vperm.xlu1 %665, %v251_v19   ;;  %308 = vperm.xlu0 %664, %v250_v20  }
  0x11   :  { %628 = vmatmul.mubr.msk.f32.gmra.mrb[2].mxu0 %vm50_vm0, %v33_v21  ;;  %640 = vmatmul.mubr.msk.f32.gmra.mrb[2].mxu1 %vm50_vm0, %v41_v22 }
  0x12   :  { %630 = vmatprep.mubr.msk.f32.mxu0 %vm50_vm0, %v34_v23  ;;  %642 = vmatprep.mubr.msk.f32.mxu1 %vm50_vm0, %v42_v24 }
  0x13   :  { %11 = vsyncpa [#allocation5], 0  ;;  %393 = vperm.xlu1 %665, %v373_v25   ;;  %390 = vperm.xlu0 %664, %v372_v26   ;;  %v36_v29 = vld [vmem:[%s1066_s1 + $0x30] sm:$0xff]  ;;  %v375_v31 = vld [vmem:[%s1069_s4 + $0x18] sm:$0xff]  ;;  %v695_v55 = vmov -1e+30  }
  0x14   :  { %v44_v30 = vld [vmem:[%s1066_s1 + $0x70] sm:$0xff]  ;;  %v37_v33 = vld [vmem:[%s1066_s1 + $0x38] sm:$0xff]  ;;  %v377_v35 = vld [vmem:[%s1069_s4 + $0x28] sm:$0xff]  ;;  %28 = vst [vmem:[#allocation2] sm:$0x1] %v695_v55 }
  0x15   :  { %v374_v32 = vld [vmem:[%s1069_s4 + $0x10] sm:$0xff]  ;;  %631 = vmatmul.mubr.msk.f32.gmra.mrb[4].mxu0 %vm50_vm0, %v35_v27  ;;  %643 = vmatmul.mubr.msk.f32.gmra.mrb[4].mxu1 %vm50_vm0, %v43_v28  ;;  %v45_v34 = vld [vmem:[%s1066_s1 + $0x78] sm:$0xff]  ;;  %v376_v36 = vld [vmem:[%s1069_s4 + $0x20] sm:$0xff]  ;;  %v696_v56 = vmov 1e+30  }
  0x16   :  { %633 = vmatprep.mubr.msk.f32.mxu0 %vm50_vm0, %v36_v29  ;;  %645 = vmatprep.mubr.msk.f32.mxu1 %vm50_vm0, %v44_v30  ;;  %v379_v37 = vld [vmem:[%s1069_s4 + $0x38] sm:$0xff]  ;;  %v378_v38 = vld [vmem:[%s1069_s4 + $0x30] sm:$0xff]  ;;  %v253_v39 = vld [vmem:[%s1067_s2 + $0x48] sm:$0xff]  ;;  %29 = vst [vmem:[#allocation3] sm:$0x1] %v696_v56 }
  0x17   :  { %399 = vperm.xlu1 %665, %v375_v31   ;;  %396 = vperm.xlu0 %664, %v374_v32   ;;  %v252_v40 = vld [vmem:[%s1067_s2 + $0x40] sm:$0xff]  ;;  %v255_v41 = vld [vmem:[%s1067_s2 + $0x58] sm:$0xff]  ;;  %v254_v42 = vld [vmem:[%s1067_s2 + $0x50] sm:$0xff] }
  0x18   :  { %v381_v43 = vld [vmem:[%s1069_s4 + $0x48] sm:$0xff]  ;;  %v380_v44 = vld [vmem:[%s1069_s4 + $0x40] sm:$0xff]  ;;  %v383_v45 = vld [vmem:[%s1069_s4 + $0x58] sm:$0xff] }
  0x19   :  { %634 = vmatmul.mubr.msk.f32.gmra.mrb[6].mxu0 %vm50_vm0, %v37_v33  ;;  %646 = vmatmul.mubr.msk.f32.gmra.mrb[6].mxu1 %vm50_vm0, %v45_v34  ;;  %v382_v46 = vld [vmem:[%s1069_s4 + $0x50] sm:$0xff]  ;;  %v257_v47 = vld [vmem:[%s1067_s2 + $0x68] sm:$0xff]  ;;  %v256_v48 = vld [vmem:[%s1067_s2 + $0x60] sm:$0xff] }
  0x1a   :  { %v259_v49 = vld [vmem:[%s1067_s2 + $0x78] sm:$0xff]  ;;  %v258_v50 = vld [vmem:[%s1067_s2 + $0x70] sm:$0xff]  ;;  %v385_v51 = vld [vmem:[%s1069_s4 + $0x68] sm:$0xff] }
  0x1b   :  { %405 = vperm.xlu1 %665, %v377_v35   ;;  %402 = vperm.xlu0 %664, %v376_v36   ;;  %v384_v52 = vld [vmem:[%s1069_s4 + $0x60] sm:$0xff]  ;;  %v387_v53 = vld [vmem:[%s1069_s4 + $0x78] sm:$0xff]  ;;  %v386_v54 = vld [vmem:[%s1069_s4 + $0x70] sm:$0xff] }
  0x1c   :  { %v940_v27 = vld [vmem:[%s1070_s5] ss:$0 sm:$0xff] }
  0x1f   :  { %411 = vperm.xlu1 %665, %v379_v37   ;;  %408 = vperm.xlu0 %664, %v378_v38  }
  0x23   :  { %323 = vperm.xlu1 %665, %v253_v39   ;;  %318 = vperm.xlu0 %664, %v252_v40  }
  0x27   :  { %333 = vperm.xlu1 %665, %v255_v41   ;;  %328 = vperm.xlu0 %664, %v254_v42  }
  0x2b   :  { %417 = vperm.xlu1 %665, %v381_v43   ;;  %414 = vperm.xlu0 %664, %v380_v44  }
  0x2f   :  { %423 = vperm.xlu1 %665, %v383_v45   ;;  %420 = vperm.xlu0 %664, %v382_v46  }
  0x33   :  { %343 = vperm.xlu1 %665, %v257_v47   ;;  %338 = vperm.xlu0 %664, %v256_v48  }
  0x37   :  { %353 = vperm.xlu1 %665, %v259_v49   ;;  %348 = vperm.xlu0 %664, %v258_v50  }
  0x3b   :  { %429 = vperm.xlu1 %665, %v385_v51   ;;  %426 = vperm.xlu0 %664, %v384_v52  }
  0x3f   :  { %435 = vperm.xlu1 %665, %v387_v53   ;;  %432 = vperm.xlu0 %664, %v386_v54  }
  0x81   :  { %v905_v57 = vpop.permute.xlu1 %288  ;;  %v279_v58 = vpop.permute.xlu0 %278 }
  0x86   :  { %v294_v59 = vpop.permute.xlu1 %293  ;;  %v284_v60 = vpop.permute.xlu0 %283 }
  0x8a   :  { %v907_v61 = vpop.permute.xlu1 %303  ;;  %v909_v62 = vpop.permute.xlu0 %298 }
  0x8e   :  { %v911_v63 = vpop.permute.xlu1 %313  ;;  %v913_v0 = vpop.permute.xlu0 %308 }
  0x92   :  { %v394_v1 = vpop.permute.xlu1 %393  ;;  %v391_v2 = vpop.permute.xlu0 %390 }
  0x93   :  { %vm442_vm1 = vcmp.eq.s32.totalorder %v394_v1, %v940_v27  ;;  %vm441_vm2 = vcmp.eq.s32.totalorder %v391_v2, %v940_v27 }
  0x96   :  { %v915_v3 = vpop.permute.xlu1 %399  ;;  %v917_v4 = vpop.permute.xlu0 %396 }
  0x97   :  { %vm444_vm3 = vcmp.eq.s32.totalorder %v915_v3, %v940_v27  ;;  %vm443_vm9 = vcmp.eq.s32.totalorder %v917_v4, %v940_v27 }
  0x9a   :  { %v919_v5 = vpop.permute.xlu1 %405  ;;  %v921_v6 = vpop.permute.xlu0 %402 }
  0x9b   :  { %vm446_vm4 = vcmp.eq.s32.totalorder %v919_v5, %v940_v27  ;;  %vm445_vm6 = vcmp.eq.s32.totalorder %v921_v6, %v940_v27 }
  0x9e   :  { %v923_v7 = vpop.permute.xlu1 %411  ;;  %v925_v8 = vpop.permute.xlu0 %408 }
  0x9f   :  { %vm448_vm11 = vcmp.eq.s32.totalorder %v923_v7, %v940_v27  ;;  %vm447_vm13 = vcmp.eq.s32.totalorder %v925_v8, %v940_v27 }
  0xa2   :  { %v324_v9 = vpop.permute.xlu1 %323  ;;  %v319_v10 = vpop.permute.xlu0 %318 }
  0xa6   :  { %v334_v11 = vpop.permute.xlu1 %333  ;;  %v927_v12 = vpop.permute.xlu0 %328 }
  0xaa   :  { %v418_v13 = vpop.permute.xlu1 %417  ;;  %v415_v14 = vpop.permute.xlu0 %414 }
  0xab   :  { %vm450_vm5 = vcmp.eq.s32.totalorder %v418_v13, %v940_v27  ;;  %vm449_vm7 = vcmp.eq.s32.totalorder %v415_v14, %v940_v27 }
  0xae   :  { %v929_v15 = vpop.permute.xlu1 %423  ;;  %v931_v16 = vpop.permute.xlu0 %420 }
  0xaf   :  { %vm452_vm8 = vcmp.eq.s32.totalorder %v929_v15, %v940_v27  ;;  %vm451_vm15 = vcmp.eq.s32.totalorder %v931_v16, %v940_v27 }
  0xb2   :  { %v344_v17 = vpop.permute.xlu1 %343  ;;  %v933_v18 = vpop.permute.xlu0 %338 }
  0xb6   :  { %v935_v19 = vpop.permute.xlu1 %353  ;;  %v942_v32 = vpop.permute.xlu0 %348 }
  0xba   :  { %v948_v35 = vpop.permute.xlu1 %429  ;;  %v427_v54 = vpop.permute.xlu0 %426 }
  0xbb   :  { %vm454_vm10 = vcmp.eq.s32.totalorder %v948_v35, %v940_v27  ;;  %vm453_vm12 = vcmp.eq.s32.totalorder %v427_v54, %v940_v27 }
  0xe0   :  { %v626_v20 = vpop.f32.mrb[0].mxu0  ;;  %v638_v21 = vpop.f32.mrb[0].mxu1 }
  0xe1   :  { %v261_v22 = vmul.f32 2.0, %v626_v20  ;;  %v269_v23 = vmul.f32 2.0, %v638_v21  ;;  %v165_v24 = vpop.f32.mrb[1].mxu0  ;;  %v205_v25 = vpop.f32.mrb[1].mxu1 }
  0xe2   :  { %v260_v26 = vmul.f32 2.0, %v165_v24  ;;  %v268_v28 = vmul.f32 2.0, %v205_v25  ;;  %v436_v21 = vpop.permute.xlu1 %435 }
  0xe3   :  { %v357_v29 = vsub.f32 %v284_v60, %v261_v22  ;;  %v365_v33 = vsub.f32 %v324_v9, %v269_v23  ;;  %vm456_vm14 = vcmp.eq.s32.totalorder %v436_v21, %v940_v27 }
  0xe4   :  { %v629_v30 = vpop.f32.mrb[2].mxu0  ;;  %v641_v31 = vpop.f32.mrb[2].mxu1  ;;  %v356_v34 = vsub.f32 %v279_v58, %v260_v26  ;;  %v364_v36 = vsub.f32 %v319_v10, %v268_v28 }
  0xe5   :  { %v263_v37 = vmul.f32 2.0, %v629_v30  ;;  %v271_v38 = vmul.f32 2.0, %v641_v31  ;;  %v458_v39 = vsel %vm442_vm1, %v357_v29, -1e+30  ;;  %v495_v40 = vsel %vm442_vm1, 1e+30, %v357_v29 }
  0xe6   :  { %v175_v41 = vpop.f32.mrb[3].mxu0  ;;  %v215_v42 = vpop.f32.mrb[3].mxu1  ;;  %v466_v43 = vsel %vm450_vm5, %v365_v33, -1e+30  ;;  %v503_v44 = vsel %vm450_vm5, 1e+30, %v365_v33 }
  0xe7   :  { %v359_v45 = vsub.f32 %v294_v59, %v263_v37  ;;  %v457_v48 = vsel %vm441_vm2, %v356_v34, -1e+30  ;;  %v367_v49 = vsub.f32 %v334_v11, %v271_v38  ;;  %v494_v55 = vsel %vm441_vm2, 1e+30, %v356_v34 }
  0xe8   :  { %v632_v46 = vpop.f32.mrb[4].mxu0  ;;  %v644_v47 = vpop.f32.mrb[4].mxu1  ;;  %v465_v56 = vsel %vm449_vm7, %v364_v36, -1e+30  ;;  %v262_v58 = vmul.f32 2.0, %v175_v41  ;;  %v270_v60 = vmul.f32 2.0, %v215_v42 }
  0xe9   :  { %v265_v50 = vmul.f32 2.0, %v632_v46  ;;  %v273_v51 = vmul.f32 2.0, %v644_v47  ;;  %v185_v52 = vpop.f32.mrb[5].mxu0  ;;  %v225_v53 = vpop.f32.mrb[5].mxu1  ;;  %v502_v59 = vsel %vm449_vm7, 1e+30, %v364_v36 }
  0xea   :  { %v460_v2 = vsel %vm444_vm3, %v359_v45, -1e+30  ;;  %v264_v13 = vmul.f32 2.0, %v185_v52  ;;  %v272_v20 = vmul.f32 2.0, %v225_v53  ;;  %v497_v14 = vsel %vm444_vm3, 1e+30, %v359_v45 }
  0xeb   :  { %v361_v1 = vsub.f32 %v907_v61, %v265_v50  ;;  %v369_v11 = vsub.f32 %v344_v17, %v273_v51  ;;  %v468_v61 = vsel %vm452_vm8, %v367_v49, -1e+30  ;;  %v505_v17 = vsel %vm452_vm8, 1e+30, %v367_v49 }
  0xec   :  { %v635_v9 = vpop.f32.mrb[6].mxu0  ;;  %v647_v10 = vpop.f32.mrb[6].mxu1  ;;  %v358_v23 = vsub.f32 %v905_v57, %v262_v58  ;;  %v366_v25 = vsub.f32 %v927_v12, %v270_v60  ;;  %v360_v28 = vsub.f32 %v909_v62, %v264_v13  ;;  %v368_v33 = vsub.f32 %v933_v18, %v272_v20 }
  0xed   :  { %v462_v22 = vsel %vm446_vm4, %v361_v1, -1e+30  ;;  %v499_v3 = vsel %vm446_vm4, 1e+30, %v361_v1  ;;  %v267_v29 = vmul.f32 2.0, %v635_v9  ;;  %v195_v30 = vpop.f32.mrb[7].mxu0 }
  0xee   :  { %v474_v24 = vmax.f32 %v458_v39, %v462_v22  ;;  %v511_v26 = vmin.f32 %v495_v40, %v499_v3  ;;  %v235_v31 = vpop.f32.mrb[7].mxu1  ;;  %v470_v15 = vsel %vm454_vm10, %v369_v11, -1e+30  ;;  %v266_v34 = vmul.f32 2.0, %v195_v30 }
  0xef   :  { %v461_v62 = vsel %vm445_vm6, %v360_v28, -1e+30  ;;  %v498_v12 = vsel %vm445_vm6, 1e+30, %v360_v28  ;;  %v275_v36 = vmul.f32 2.0, %v647_v10  ;;  %v363_v41 = vsub.f32 %v911_v63, %v267_v29 }
  0xf0   :  { %v478_v57 = vmax.f32 %v474_v24, %v466_v43  ;;  %v515_v5 = vmin.f32 %v511_v26, %v503_v44  ;;  %v507_v38 = vsel %vm454_vm10, 1e+30, %v369_v11  ;;  %v473_v18 = vmax.f32 %v457_v48, %v461_v62 }
  0xf1   :  { %v510_v39 = vmin.f32 %v494_v55, %v498_v12  ;;  %v362_v42 = vsub.f32 %v913_v0, %v266_v34  ;;  %v274_v43 = vmul.f32 2.0, %v235_v31  ;;  %v459_v44 = vsel %vm443_vm9, %v358_v23, -1e+30  ;;  %v433_v55 = vpop.permute.xlu0 %432 }
  0xf2   :  { %v482_v37 = vmax.f32 %v478_v57, %v470_v15  ;;  %v519_v40 = vmin.f32 %v515_v5, %v507_v38  ;;  %v469_v6 = vsel %vm453_vm12, %v368_v33, -1e+30  ;;  %v477_v45 = vmax.f32 %v473_v18, %v465_v56  ;;  %v531_v57 = vld [vmem:[#allocation2] sm:$0x1] }
  0xf3   :  { %v514_v46 = vmin.f32 %v510_v39, %v502_v59  ;;  %v506_v35 = vsel %vm453_vm12, 1e+30, %v368_v33  ;;  %v464_v47 = vsel %vm448_vm11, %v363_v41, -1e+30  ;;  %v501_v63 = vsel %vm448_vm11, 1e+30, %v363_v41 }
  0xf4   :  { %v371_v0 = vsub.f32 %v935_v19, %v275_v36  ;;  %v481_v48 = vmax.f32 %v477_v45, %v469_v6  ;;  %v476_v50 = vmax.f32 %v460_v2, %v464_v47  ;;  %v513_v51 = vmin.f32 %v497_v14, %v501_v63  ;;  %v534_v33 = vld [vmem:[#allocation3] sm:$0x1]  ;;  %v540_v36 = vld [vmem:[%s1068_s3] sm:$0x1]  ;;  %s697_s3 = smov [#allocation4]  }
  0xf5   :  { %v518_v49 = vmin.f32 %v514_v46, %v506_v35  ;;  %v496_v52 = vsel %vm443_vm9, 1e+30, %v358_v23  ;;  %v463_v53 = vsel %vm447_vm13, %v362_v42, -1e+30  ;;  %v500_v54 = vsel %vm447_vm13, 1e+30, %v362_v42 }
  0xf6   :  { %v370_v7 = vsub.f32 %v942_v32, %v274_v43  ;;  %v485_v19 = vmax.f32 %v481_v48, %v482_v37  ;;  %v480_v58 = vmax.f32 %v476_v50, %v468_v61  ;;  %v517_v59 = vmin.f32 %v513_v51, %v505_v17  ;;  %s571_s24 = sshll.u32 %s697_s3, 4  ;;  %s572_s24 = int_to_ptr.vmem [resolvable:$true] %s571_s24 }
  0xf7   :  { %v522_v56 = vmin.f32 %v518_v49, %v519_v40  ;;  %v472_v60 = vsel %vm456_vm14, %v371_v0, -1e+30  ;;  %v509_v4 = vsel %vm456_vm14, 1e+30, %v371_v0  ;;  %v475_v1 = vmax.f32 %v459_v44, %v463_v53  ;;  %s670_s25 = scalar_lea.vmem %s572_s24, 16  ;;  %s674_s26 = scalar_lea.vmem %s572_s24, 32 }
  0xf8   :  { %v512_v9 = vmin.f32 %v496_v52, %v500_v54  ;;  %v467_v8 = vsel %vm451_vm15, %v366_v25, -1e+30  ;;  %v504_v32 = vsel %vm451_vm15, 1e+30, %v366_v25  ;;  %v484_v10 = vmax.f32 %v480_v58, %v472_v60  ;;  %p671_p0 = scmp.ne.s32.totalorder %s572_s24, %s670_s25  ;;  %p675_p1 = scmp.lt.s32.totalorder %s572_s24, %s572_s24 }
  0xf9   :  { %v521_v2 = vmin.f32 %v517_v59, %v509_v4  ;;  %vm455_vm0 = vcmp.eq.s32.totalorder %v433_v55, %v940_v27  ;;  %v479_v11 = vmax.f32 %v475_v1, %v467_v8  ;;  %p676_p2 = scmp.lt.s32.totalorder %s674_s26, %s670_s25 }
  0xfa   :  { %v516_v13 = vmin.f32 %v512_v9, %v504_v32  ;;  %v471_v20 = vsel %vm455_vm0, %v370_v7, -1e+30  ;;  %v508_v14 = vsel %vm455_vm0, 1e+30, %v370_v7 }
  0xfb   :  { %v483_v21 = vmax.f32 %v479_v11, %v471_v20  ;;  %p677_p3 = por %p676_p2, %p675_p1 }
  0xfc   :  { %v520_v61 = vmin.f32 %v516_v13, %v508_v14 }
  0xfd   :  { %v486_v22 = vmax.f32 %v483_v21, %v484_v10  ;;  %p678_p4 = pnand %p677_p3, %p671_p0 }
  0xfe   :  { %v523_v17 = vmin.f32 %v520_v61, %v521_v2 }
  0xff   :  { %v487_v23 = vmax.f32 %v485_v19, %v486_v22 }
 0x100   :  { %v524_v24 = vmin.f32 %v522_v56, %v523_v17 }
 0x101   :  { %v488_v3 = vrot.slane %v487_v23, 4 }
 0x102   :  { %v525_v26 = vrot.slane %v524_v24, 4 }
 0x103   :  { %v489_v28 = vmax.f32 %v487_v23, %v488_v3 }
 0x104   :  { %v526_v29 = vmin.f32 %v524_v24, %v525_v26 }
 0x105   :  { %v490_v16 = vrot.slane %v489_v28, 2 }
 0x106   :  { %v527_v25 = vrot.slane %v526_v29, 2 }
 0x107   :  { %v491_v30 = vmax.f32 %v489_v28, %v490_v16 }
 0x108   :  { %v528_v31 = vmin.f32 %v526_v29, %v527_v25 }
 0x109   :  { %v492_v15 = vrot.slane %v491_v30, 1 }
 0x10a   :  { %v529_v27 = vrot.slane %v528_v31, 1 }
 0x10b   :  { %v493_v34 = vmax.f32 %v491_v30, %v492_v15 }
 0x10c   :  { %v530_v5 = vmin.f32 %v528_v31, %v529_v27 }
 0x10d   :  { %v532_v62 = vmax.f32 %v531_v57, %v493_v34 }
 0x10e   :  { %v535_v12 = vmin.f32 %v534_v33, %v530_v5 }
 0x10f   :  { %533 = vst [vmem:[#allocation2] sm:$0x1] %v532_v62 }
 0x110   :  { %536 = vst [vmem:[#allocation3] sm:$0x1] %v535_v12 }
 0x116   :  { %v541_v37 = vld [vmem:[#allocation2] sm:$0x1] }
 0x117   :  { %v551_v38 = vld [vmem:[#allocation3] sm:$0x1]  ;;  %v542_v18 = vadd.f32 %v541_v37, %v540_v36 }
 0x118   :  { %v552_v39 = vadd.f32 %v551_v38, %v540_v36 }
 0x119   :  { %v543_v40 = vmax.f32 %v542_v18, 1e-12 }
 0x11a   :  { %v553_v41 = vmax.f32 %v552_v39, 1e-12 }
 0x11b   :  { %666 = vrsqrt.f32 %v543_v40  ;;  %vm546_vm1 = vcmp.eq.f32.partialorder %v543_v40, inf  ;;  %v549_v6 = vand.u32 2147483648, %v543_v40  ;;  %vm548_vm2 = vcmp.eq.f32.partialorder %v543_v40, 0.0 }
 0x11c   :  { %668 = vrsqrt.f32 %v553_v41  ;;  %vm556_vm3 = vcmp.eq.f32.partialorder %v553_v41, inf  ;;  %v559_v35 = vand.u32 2147483648, %v553_v41  ;;  %vm558_vm4 = vcmp.eq.f32.partialorder %v553_v41, 0.0 }
 0x125   :  { %v667_v42 = vpop.eup %666 }
 0x126   :  { %v669_v43 = vpop.eup %668  ;;  %v545_v44 = vmul.f32 %v667_v42, %v543_v40 }
 0x127   :  { %v555_v45 = vmul.f32 %v669_v43, %v553_v41 }
 0x128   :  { %v547_v46 = vsel %vm546_vm1, %v543_v40, %v545_v44 }
 0x129   :  { %v550_v47 = vsel %vm548_vm2, %v549_v6, %v547_v46  ;;  %v557_v63 = vsel %vm556_vm3, %v553_v41, %v555_v45 }
 0x12a   :  { %v560_v0 = vsel %vm558_vm4, %v559_v35, %v557_v63 }
 0x12b   :  { %v561_v48 = vsub.f32 %v550_v47, %v560_v0 }
 0x12d   :  { %v562_v49 = vadd.f32 0.3, %v561_v48 }
 0x12f   :  { %v563_v50 = vmax.f32 %v562_v49, 0.0 }
 0x131   :  { %564 = vst [vmem:[#allocation4] sm:$0x1] %v563_v50 }
 0x132   :  { %681 = shalt.err (!%p678_p4)
}
 0x133   :  { %s682_s29 = scalar_lea.hbm %s1071_s6, 16 }
 0x134   :  { %p683_p5 = scmp.ne.s32.totalorder %s1071_s6, %s682_s29  ;;  %p686_p6 = scmp.lt.u32.totalorder %s682_s29, %s1071_s6 }
 0x136   :  { %p688_p7 = pnand %p686_p6, %p683_p5 }
 0x138   :  { %691 = shalt.err (!%p688_p7)
}
 0x139   :  { %574 = dma.vmem_to_hbm [thread:$0]  %s572_s24, 16, %s1071_s6, [#allocation5]  }
 0x13a   :  { %692 = dma.done.wait [#allocation5], 16  }
 0x13b   :  { %693 = vsyncadd [#allocation5], 4294967280 }
 0x13c   :  { %578 = vsyncpa [#allocation5], 1 }

</bundles_post_ra>
